<compile_context>
chip_gen: v7x
topology: tpu7x:2x2x1
jax: 0.10.0
libtpu: 0.0.40
codegen_flags: <defaults>
</compile_context>

<pallas_src>
import functools

import jax
import jax.numpy as jnp
from jax.experimental import pallas as pl
from jax.experimental.pallas import tpu as pltpu


def _sigmoid(z):
    # Exact identity: sigmoid(z) == 0.5 * (tanh(z/2) + 1)  (single EUP tanh,
    # avoids relying on a logistic lowering; weights stay unmodified).
    return 0.5 * (jnp.tanh(0.5 * z) + 1.0)


# --------------------------------------------------------------------------
# Single-step kernel == CustomLSTMLayer.forward
# --------------------------------------------------------------------------
def lstm_cell_kernel(x_ref, h_ref, c_ref, ct_ref, wx_ref, v_ref, b_ref, out_ref):
    """One LSTM-cell step.

    x_ref  : (B, In)    input
    h_ref  : (B, H)     h_prev
    c_ref  : (B, H)     c_prev
    ct_ref : (B, H)     c_prev_tilde
    wx_ref : (In, 4H)   input weights,  gate order [f|i|o|c]
    v_ref  : (H, 4H)    hidden weights, gate order [f|i|o|c]
    b_ref  : (1, 4H)    fused bias (Linear biases + extra b_gate)
    out_ref: (B, 4H)    packed [h_next | c_next | c_tilde | zero-pad]
    """
    H = h_ref.shape[1]
    gates = (
        jnp.dot(x_ref[...], wx_ref[...], preferred_element_type=jnp.float32)
        + jnp.dot(h_ref[...], v_ref[...], preferred_element_type=jnp.float32)
        + b_ref[...]
    )
    fio = _sigmoid(gates[:, : 3 * H])
    f_t = fio[:, 0 * H:1 * H]
    i_t = fio[:, 1 * H:2 * H]
    o_t = fio[:, 2 * H:3 * H]
    c_tilde = jnp.tanh(gates[:, 3 * H:4 * H])

    c_next = f_t * c_ref[...] + i_t * ct_ref[...]
    h_next = o_t * jnp.tanh(c_next)

    # Single lane-dense (B, 4H) unmasked store; 4th quarter is zeroed padding.
    pad = jnp.zeros_like(c_tilde)
    out_ref[...] = jnp.concatenate([h_next, c_next, c_tilde, pad], axis=1)


@jax.jit
def lstm_cell(x, h_prev, c_prev, c_prev_tilde, Wx, V, b):
    """Module-equivalent forward: returns (h_next, c_next, c_tilde)."""
    B = x.shape[0]
    H = h_prev.shape[1]
    packed = pl.pallas_call(
        lstm_cell_kernel,
        out_shape=jax.ShapeDtypeStruct((B, 4 * H), jnp.float32),
    )(x, h_prev, c_prev, c_prev_tilde, Wx, V, b.reshape(1, 4 * H))
    return packed[:, :H], packed[:, H:2 * H], packed[:, 2 * H:3 * H]


# --------------------------------------------------------------------------
# Sequence kernel: the module forward applied T times inside ONE pallas_call.
# Recurrence: (h, c, c_tilde)_t feeds (h_prev, c_prev, c_prev_tilde)_{t+1}.
# --------------------------------------------------------------------------
def lstm_seq_kernel(xproj_ref, v_ref, init_ref, hseq_ref, final_ref,
                    h_s, c_s, ct_s):
    """Grid = (batch_tiles, T); time axis serial, state carried in VMEM scratch.

    xproj_ref: (1, bt, 4H)  precomputed x_t @ Wx + b for this timestep
    v_ref    : (H, 4H)      recurrent weights (constant index_map -> resident)
    init_ref : (3, bt, H)   stacked [h0 | c0 | c0_tilde]
    hseq_ref : (1, bt, H)   h_t output for this timestep
    final_ref: (bt, 2H)     [c_T | c_tilde_T], written at the last step
    h_s/c_s/ct_s: (bt, H)   VMEM scratch carrying state across timesteps
    """
    t = pl.program_id(1)

    @pl.when(t == 0)
    def _():
        h_s[...] = init_ref[0]
        c_s[...] = init_ref[1]
        ct_s[...] = init_ref[2]

    H = h_s.shape[1]
    # Serial per-step work: only the recurrent matmul + gate epilogue.
    gates = xproj_ref[0] + jnp.dot(
        h_s[...], v_ref[...], preferred_element_type=jnp.float32)

    fio = _sigmoid(gates[:, : 3 * H])
    f_t = fio[:, 0 * H:1 * H]
    i_t = fio[:, 1 * H:2 * H]
    o_t = fio[:, 2 * H:3 * H]
    c_tilde = jnp.tanh(gates[:, 3 * H:4 * H])

    c_next = f_t * c_s[...] + i_t * ct_s[...]
    h_next = o_t * jnp.tanh(c_next)

    h_s[...] = h_next
    c_s[...] = c_next
    ct_s[...] = c_tilde
    hseq_ref[0] = h_next

    @pl.when(t == pl.num_programs(1) - 1)
    def _():
        final_ref[...] = jnp.concatenate([c_next, c_tilde], axis=1)


@functools.partial(jax.jit, static_argnames=("batch_tile",))
def lstm_sequence(x_seq, h0, c0, c0_tilde, Wx, V, b, *, batch_tile=None):
    """Runs the cell over x_seq (T, B, In). Returns (h_seq, c_T, c_tilde_T)."""
    T, B, In = x_seq.shape
    H = h0.shape[1]
    bt = B if batch_tile is None else batch_tile
    assert B % bt == 0
    nb = B // bt

    # (1) Input projection hoisted out of the recurrence: one big MXU-friendly
    #     batched matmul over all T*B rows (plain XLA, outside the kernel).
    xproj = (x_seq.reshape(T * B, In) @ Wx + b).reshape(T, B, 4 * H)
    init = jnp.stack([h0, c0, c0_tilde], axis=0)  # (3, B, H)

    h_seq, final = pl.pallas_call(
        lstm_seq_kernel,
        out_shape=(
            jax.ShapeDtypeStruct((T, B, H), jnp.float32),     # h_t per step
            jax.ShapeDtypeStruct((B, 2 * H), jnp.float32),    # [c_T | c_tilde_T]
        ),
        grid_spec=pltpu.PrefetchScalarGridSpec(
            num_scalar_prefetch=0,
            grid=(nb, T),
            in_specs=[
                pl.BlockSpec((1, bt, 4 * H), lambda bi, t: (t, bi, 0)),  # xproj[t]
                pl.BlockSpec((H, 4 * H), lambda bi, t: (0, 0)),          # V resident
                pl.BlockSpec((3, bt, H), lambda bi, t: (0, bi, 0)),      # init state
            ],
            out_specs=[
                pl.BlockSpec((1, bt, H), lambda bi, t: (t, bi, 0)),
                pl.BlockSpec((bt, 2 * H), lambda bi, t: (bi, 0)),
            ],
            scratch_shapes=[pltpu.VMEM((bt, H), jnp.float32)] * 3,
        ),
        compiler_params=pltpu.CompilerParams(
            dimension_semantics=("parallel", "arbitrary"),
            vmem_limit_bytes=32 * 1024 * 1024,
        ),
    )(xproj, V, init)

    return h_seq, final[:, :H], final[:, H:]


# --------------------------------------------------------------------------
# Synthetic params (mirroring the PyTorch module structure) & pure-JAX reference
# --------------------------------------------------------------------------
def make_params(key, input_size, hidden_size):
    """Gate order [f|i|o|c].  Returns Wx (In,4H), V (H,4H), b (4H,)."""
    keys = iter(jax.random.split(key, 16))

    def linear(fan_in, fan_out):
        bound = jnp.sqrt(6.0 / (fan_in + fan_out))               # xavier_uniform
        w = jax.random.uniform(next(keys), (fan_in, fan_out), jnp.float32,
                               -bound, bound)
        bb = 1.0 / jnp.sqrt(fan_in)
        bias = jax.random.uniform(next(keys), (fan_out,), jnp.float32, -bb, bb)
        return w, bias

    Ws, Vs, bs = [], [], []
    for g in ("f", "i", "o", "c"):
        Wg, Wb = linear(input_size, hidden_size)
        Vg, Vb = linear(hidden_size, hidden_size)
        extra = (jnp.ones((hidden_size,), jnp.float32) if g == "f"
                 else jnp.zeros((hidden_size,), jnp.float32))     # b_f = 1, rest 0
        Ws.append(Wg); Vs.append(Vg); bs.append(Wb + Vb + extra)

    return (jnp.concatenate(Ws, axis=1),
            jnp.concatenate(Vs, axis=1),
            jnp.concatenate(bs))


def reference_step(x, h_prev, c_prev, c_prev_tilde, Wx, V, b):
    """Pure-JAX mirror of CustomLSTMLayer.forward."""
    H = h_prev.shape[1]
    gates = x @ Wx + h_prev @ V + b
    f_t = jax.nn.sigmoid(gates[:, 0 * H:1 * H])
    i_t = jax.nn.sigmoid(gates[:, 1 * H:2 * H])
    o_t = jax.nn.sigmoid(gates[:, 2 * H:3 * H])
    c_tilde = jnp.tanh(gates[:, 3 * H:4 * H])
    c_next = f_t * c_prev + i_t * c_prev_tilde
    h_next = o_t * jnp.tanh(c_next)
    return h_next, c_next, c_tilde


if __name__ == "__main__":
    batch = 8
    input_size = 16
    hidden_size = 32    # 4H = 128 -> lane-dense fused gate width
    seq_len = 8

    key = jax.random.PRNGKey(0)
    k_params, kx, kh, kc, kct, kxs = jax.random.split(key, 6)

    Wx, V, b = make_params(k_params, input_size, hidden_size)

    x = jax.random.normal(kx, (batch, input_size), jnp.float32)
    h0 = jax.random.normal(kh, (batch, hidden_size), jnp.float32)
    c0 = jax.random.normal(kc, (batch, hidden_size), jnp.float32)
    ct0 = jax.random.normal(kct, (batch, hidden_size), jnp.float32)
    x_seq = jax.random.normal(kxs, (seq_len, batch, input_size), jnp.float32)

    # ---- single step (exact module forward) ----
    h1, c1, ct1 = lstm_cell(x, h0, c0, ct0, Wx, V, b)
    jax.block_until_ready((h1, c1, ct1))
    h1_r, c1_r, ct1_r = reference_step(x, h0, c0, ct0, Wx, V, b)
    assert jnp.allclose(h1, h1_r, atol=1e-4, rtol=1e-4)
    assert jnp.allclose(c1, c1_r, atol=1e-4, rtol=1e-4)
    assert jnp.allclose(ct1, ct1_r, atol=1e-4, rtol=1e-4)

    # ---- whole sequence in one pallas_call (structural optimization) ----
    h_seq, c_T, ct_T = lstm_sequence(x_seq, h0, c0, ct0, Wx, V, b)
    jax.block_until_ready((h_seq, c_T, ct_T))

    h_r, c_r, ct_r = h0, c0, ct0
    h_seq_r = []
    for t in range(seq_len):
        h_r, c_r, ct_r = reference_step(x_seq[t], h_r, c_r, ct_r, Wx, V, b)
        h_seq_r.append(h_r)
    h_seq_r = jnp.stack(h_seq_r, axis=0)

    # Tolerance covers default (bf16-pass) MXU precision drift over T steps.
    assert jnp.allclose(h_seq, h_seq_r, atol=2e-3, rtol=2e-3)
    assert jnp.allclose(c_T, c_r, atol=2e-3, rtol=2e-3)
    assert jnp.allclose(ct_T, ct_r, atol=2e-3, rtol=2e-3)

    print("KERNEL_OK")
</pallas_src>

<mosaic_0001>
module attributes {stable_mosaic.version = 11 : i64} {
  func.func @lstm_cell_kernel(%arg0: memref<8x16xf32, #tpu.memory_space<vmem>>, %arg1: memref<8x32xf32, #tpu.memory_space<vmem>>, %arg2: memref<8x32xf32, #tpu.memory_space<vmem>>, %arg3: memref<8x32xf32, #tpu.memory_space<vmem>>, %arg4: memref<16x128xf32, #tpu.memory_space<vmem>>, %arg5: memref<32x128xf32, #tpu.memory_space<vmem>>, %arg6: memref<1x128xf32, #tpu.memory_space<vmem>>, %arg7: memref<8x128xf32, #tpu.memory_space<vmem>>) attributes {dimension_semantics = [], scalar_prefetch = 0 : i64, scratch_operands = 0 : i64, tpu.core_type = #tpu.core_type<tc>} {
    %c0 = arith.constant 0 : index
    %c0_0 = arith.constant 0 : index
    %0 = vector.load %arg0[%c0, %c0_0] : memref<8x16xf32, #tpu.memory_space<vmem>>, vector<8x16xf32>
    %c0_1 = arith.constant 0 : index
    %c0_2 = arith.constant 0 : index
    %1 = vector.load %arg4[%c0_1, %c0_2] : memref<16x128xf32, #tpu.memory_space<vmem>>, vector<16x128xf32>
    %cst = arith.constant dense<0.000000e+00> : vector<8x128xf32>
    %2 = tpu.matmul %0, %1, %cst {dimension_numbers = #tpu.dot_dimension_numbers<[1], [0], [0], [1], [0, 0, 1, 1], [], []>} : vector<8x16xf32>, vector<16x128xf32>, vector<8x128xf32> -> vector<8x128xf32>
    %c0_3 = arith.constant 0 : index
    %c0_4 = arith.constant 0 : index
    %3 = vector.load %arg1[%c0_3, %c0_4] : memref<8x32xf32, #tpu.memory_space<vmem>>, vector<8x32xf32>
    %c0_5 = arith.constant 0 : index
    %c0_6 = arith.constant 0 : index
    %4 = vector.load %arg5[%c0_5, %c0_6] : memref<32x128xf32, #tpu.memory_space<vmem>>, vector<32x128xf32>
    %cst_7 = arith.constant dense<0.000000e+00> : vector<8x128xf32>
    %5 = tpu.matmul %3, %4, %cst_7 {dimension_numbers = #tpu.dot_dimension_numbers<[1], [0], [0], [1], [0, 0, 1, 1], [], []>} : vector<8x32xf32>, vector<32x128xf32>, vector<8x128xf32> -> vector<8x128xf32>
    %6 = arith.addf %2, %5 : vector<8x128xf32>
    %c0_8 = arith.constant 0 : index
    %c0_9 = arith.constant 0 : index
    %7 = vector.load %arg6[%c0_8, %c0_9] : memref<1x128xf32, #tpu.memory_space<vmem>>, vector<1x128xf32>
    %8 = vector.broadcast %7 : vector<1x128xf32> to vector<8x128xf32>
    %9 = arith.addf %6, %8 : vector<8x128xf32>
    %10 = vector.extract_strided_slice %9 {offsets = [0, 0], sizes = [8, 96], strides = [1, 1]} : vector<8x128xf32> to vector<8x96xf32>
    %cst_10 = arith.constant 5.000000e-01 : f32
    %11 = vector.broadcast %cst_10 : f32 to vector<8x96xf32>
    %12 = arith.mulf %11, %10 : vector<8x96xf32>
    %13 = math.tanh %12 : vector<8x96xf32>
    %cst_11 = arith.constant 1.000000e+00 : f32
    %14 = vector.broadcast %cst_11 : f32 to vector<8x96xf32>
    %15 = arith.addf %13, %14 : vector<8x96xf32>
    %cst_12 = arith.constant 5.000000e-01 : f32
    %16 = vector.broadcast %cst_12 : f32 to vector<8x96xf32>
    %17 = arith.mulf %16, %15 : vector<8x96xf32>
    %18 = vector.extract_strided_slice %17 {offsets = [0, 0], sizes = [8, 32], strides = [1, 1]} : vector<8x96xf32> to vector<8x32xf32>
    %19 = vector.extract_strided_slice %17 {offsets = [0, 32], sizes = [8, 32], strides = [1, 1]} : vector<8x96xf32> to vector<8x32xf32>
    %20 = vector.extract_strided_slice %17 {offsets = [0, 64], sizes = [8, 32], strides = [1, 1]} : vector<8x96xf32> to vector<8x32xf32>
    %21 = vector.extract_strided_slice %9 {offsets = [0, 96], sizes = [8, 32], strides = [1, 1]} : vector<8x128xf32> to vector<8x32xf32>
    %22 = math.tanh %21 : vector<8x32xf32>
    %c0_13 = arith.constant 0 : index
    %c0_14 = arith.constant 0 : index
    %23 = vector.load %arg2[%c0_13, %c0_14] : memref<8x32xf32, #tpu.memory_space<vmem>>, vector<8x32xf32>
    %24 = arith.mulf %18, %23 : vector<8x32xf32>
    %c0_15 = arith.constant 0 : index
    %c0_16 = arith.constant 0 : index
    %25 = vector.load %arg3[%c0_15, %c0_16] : memref<8x32xf32, #tpu.memory_space<vmem>>, vector<8x32xf32>
    %26 = arith.mulf %19, %25 : vector<8x32xf32>
    %27 = arith.addf %24, %26 : vector<8x32xf32>
    %28 = math.tanh %27 : vector<8x32xf32>
    %29 = arith.mulf %20, %28 : vector<8x32xf32>
    %cst_17 = arith.constant 0.000000e+00 : f32
    %30 = vector.broadcast %cst_17 : f32 to vector<8x32xf32>
    %31 = tpu.concatenate %29, %27, %22, %30 in 1 : vector<8x32xf32>, vector<8x32xf32>, vector<8x32xf32>, vector<8x32xf32> -> vector<8x128xf32>
    %c0_18 = arith.constant 0 : index
    %c0_19 = arith.constant 0 : index
    %32 = vector.load %arg7[%c0_18, %c0_19] : memref<8x128xf32, #tpu.memory_space<vmem>>, vector<8x128xf32>
    tpu.vector_store %arg7[%c0_18, %c0_19], %31 {strides = array<i32>} : memref<8x128xf32, #tpu.memory_space<vmem>>, vector<8x128xf32>,
    return
  }
}

</mosaic_0001>

<bundles_post_ra>
// kernel: lstm_cell.1
= control target key start
LH: loop header
LB: loop body
LE: loop exit
PB: predicated region body
PF: predicated region fallthrough
CT: control target
= control target key end

     0   :  { %12 = vsyncpa [#allocation3], 0  ;;  %s601_s0 = inlined_call_operand.hbm [shape: f32[8,16], index: 0, kind: input, shape index: {}]   ;;  %s602_s1 = inlined_call_operand.hbm [shape: f32[8,32], index: 1, kind: input, shape index: {}]   ;;  %s603_s2 = inlined_call_operand.hbm [shape: f32[8,32], index: 2, kind: input, shape index: {}]   ;;  %s604_s3 = inlined_call_operand.hbm [shape: f32[8,32], index: 3, kind: input, shape index: {}]   ;;  %s605_s4 = inlined_call_operand.vmem [shape: f32[16,128], index: 4, kind: input, shape index: {}]   ;;  %s606_s5 = inlined_call_operand.hbm [shape: f32[32,128], index: 5, kind: input, shape index: {}]   ;;  %s607_s6 = inlined_call_operand.vmem [shape: f32[1,128], index: 6, kind: input, shape index: {}]   ;;  %s608_s7 = inlined_call_operand.vmem [shape: f32[8,128], index: 7, kind: output, shape index: {}]  }
   0x1   :  { %13 = vsyncpa [#allocation5], 0 }
   0x2   :  { %14 = vsyncpa [#allocation8], 0  ;;  %s472_s24 = smov [#allocation4]   ;;  %s473_s26 = smov [#allocation7]  }
   0x3   :  { %s31_s25 = sshll.u32 %s472_s24, 4  ;;  %s51_s27 = sshll.u32 %s473_s26, 4  ;;  %s32_s25 = int_to_ptr.vmem [resolvable:$true] %s31_s25  ;;  %s52_s27 = int_to_ptr.vmem [resolvable:$true] %s51_s27 }
   0x4   :  { %s356_s30 = scalar_lea.hbm %s602_s1, 128 }
   0x5   :  { %p357_p0 = scmp.ne.s32.totalorder %s602_s1, %s356_s30  ;;  %p360_p1 = scmp.lt.u32.totalorder %s356_s30, %s602_s1 }
   0x7   :  { %p362_p2 = pnand %p360_p1, %p357_p0 }
   0x9   :  { %365 = shalt.err (!%p362_p2)
}
   0xa   :  { %s366_s12 = scalar_lea.vmem %s32_s25, 128  ;;  %p371_p4 = scmp.lt.s32.totalorder %s32_s25, %s32_s25 }
   0xb   :  { %p367_p3 = scmp.ne.s32.totalorder %s32_s25, %s366_s12  ;;  %p372_p5 = scmp.lt.s32.totalorder %s366_s12, %s366_s12 }
   0xd   :  { %p373_p6 = por %p372_p5, %p371_p4 }
   0xf   :  { %p374_p7 = pnand %p373_p6, %p367_p3 }
  0x11   :  { %377 = shalt.err (!%p374_p7)
}
  0x12   :  { %34 = dma.hbm_to_vmem [thread:$0]  %s602_s1, 128, %s32_s25, [#allocation5]  }
  0x13   :  { %s378_s17 = scalar_lea.hbm %s604_s3, 128 }
  0x14   :  { %p379_p8 = scmp.ne.s32.totalorder %s604_s3, %s378_s17  ;;  %p382_p9 = scmp.lt.u32.totalorder %s378_s17, %s604_s3 }
  0x16   :  { %p384_p10 = pnand %p382_p9, %p379_p8 }
  0x18   :  { %387 = shalt.err (!%p384_p10)
}
  0x19   :  { %s388_s22 = scalar_lea.vmem %s52_s27, 128  ;;  %p393_p12 = scmp.lt.s32.totalorder %s52_s27, %s52_s27 }
  0x1a   :  { %p389_p11 = scmp.ne.s32.totalorder %s52_s27, %s388_s22  ;;  %p394_p13 = scmp.lt.s32.totalorder %s388_s22, %s388_s22 }
  0x1c   :  { %p395_p0 = por %p394_p13, %p393_p12 }
  0x1e   :  { %p396_p1 = pnand %p395_p0, %p389_p11 }
  0x20   :  { %399 = shalt.err (!%p396_p1)
}
  0x21   :  { %54 = dma.hbm_to_vmem [thread:$0]  %s604_s3, 128, %s52_s27, [#allocation8]  }
  0x22   :  { %s474_s24 = smov [#allocation2]   ;;  %s475_s26 = smov [#allocation6]  }
  0x23   :  { %s21_s25 = sshll.u32 %s474_s24, 4  ;;  %s41_s28 = sshll.u32 %s475_s26, 4  ;;  %s22_s25 = int_to_ptr.vmem [resolvable:$true] %s21_s25  ;;  %s42_s28 = int_to_ptr.vmem [resolvable:$true] %s41_s28 }
  0x24   :  { %s400_s8 = scalar_lea.hbm %s601_s0, 128 }
  0x25   :  { %p401_p2 = scmp.ne.s32.totalorder %s601_s0, %s400_s8  ;;  %p404_p3 = scmp.lt.u32.totalorder %s400_s8, %s601_s0 }
  0x27   :  { %p406_p4 = pnand %p404_p3, %p401_p2 }
  0x29   :  { %409 = shalt.err (!%p406_p4)
}
  0x2a   :  { %s410_s3 = scalar_lea.vmem %s22_s25, 128  ;;  %p415_p6 = scmp.lt.s32.totalorder %s22_s25, %s22_s25 }
  0x2b   :  { %p411_p5 = scmp.ne.s32.totalorder %s22_s25, %s410_s3  ;;  %p416_p7 = scmp.lt.s32.totalorder %s410_s3, %s410_s3 }
  0x2d   :  { %p417_p8 = por %p416_p7, %p415_p6 }
  0x2f   :  { %p418_p9 = pnand %p417_p8, %p411_p5 }
  0x31   :  { %421 = shalt.err (!%p418_p9)
}
  0x32   :  { %24 = dma.hbm_to_vmem [thread:$0]  %s601_s0, 128, %s22_s25, [#allocation3]  }
  0x33   :  { %s422_s16 = scalar_lea.hbm %s603_s2, 128 }
  0x34   :  { %p423_p10 = scmp.ne.s32.totalorder %s603_s2, %s422_s16  ;;  %p426_p11 = scmp.lt.u32.totalorder %s422_s16, %s603_s2 }
  0x36   :  { %p428_p12 = pnand %p426_p11, %p423_p10 }
  0x38   :  { %431 = shalt.err (!%p428_p12)
}
  0x39   :  { %s432_s21 = scalar_lea.vmem %s42_s28, 128  ;;  %p437_p0 = scmp.lt.s32.totalorder %s42_s28, %s42_s28 }
  0x3a   :  { %p433_p13 = scmp.ne.s32.totalorder %s42_s28, %s432_s21  ;;  %p438_p1 = scmp.lt.s32.totalorder %s432_s21, %s432_s21 }
  0x3c   :  { %p439_p2 = por %p438_p1, %p437_p0 }
  0x3e   :  { %p440_p3 = pnand %p439_p2, %p433_p13 }
  0x40   :  { %443 = shalt.err (!%p440_p3)
}
  0x41   :  { %44 = dma.hbm_to_vmem [thread:$0]  %s603_s2, 128, %s42_s28, [#allocation5]  }
  0x42   :  { %s476_s1 = smov [#allocation9]   ;;  %s444_s26 = scalar_lea.hbm %s606_s5, 512 }
  0x43   :  { %s62_s23 = sshll.u32 %s476_s1, 4  ;;  %p445_p4 = scmp.ne.s32.totalorder %s606_s5, %s444_s26  ;;  %s63_s23 = int_to_ptr.vmem [resolvable:$true] %s62_s23 }
  0x44   :  { %p448_p5 = scmp.lt.u32.totalorder %s444_s26, %s606_s5 }
  0x46   :  { %p450_p6 = pnand %p448_p5, %p445_p4 }
  0x48   :  { %453 = shalt.err (!%p450_p6)
}
  0x49   :  { %s454_s10 = scalar_lea.vmem %s63_s23, 512  ;;  %p459_p8 = scmp.lt.s32.totalorder %s63_s23, %s63_s23 }
  0x4a   :  { %p455_p7 = scmp.ne.s32.totalorder %s63_s23, %s454_s10  ;;  %p460_p9 = scmp.lt.s32.totalorder %s454_s10, %s454_s10 }
  0x4c   :  { %p461_p10 = por %p460_p9, %p459_p8 }
  0x4e   :  { %p462_p11 = pnand %p461_p10, %p455_p7 }
  0x50   :  { %465 = shalt.err (!%p462_p11)
}
  0x51   :  { %s477_s2 = smov 128   ;;  %s478_s28 = smov 8  }
  0x52   :  { %68 = dma.hbm_to_vmem [thread:$0]  %s606_s5, 512, %s63_s23, [#allocation8], %s477_s2, %s477_s2, %s478_s28  }
  0x53   :  { %466 = dma.done.wait [#allocation3], 128  }
  0x54   :  { %467 = vsyncadd [#allocation3], 4294967168 }
  0x55   :  { %468 = dma.done.wait [#allocation5], 256  }
  0x56   :  { %469 = vsyncadd [#allocation5], 4294967040 }
  0x57   :  { %470 = dma.done.wait [#allocation8], 640  }
  0x58   :  { %471 = vsyncadd [#allocation8], 4294966656  ;;  %v479_v0 = vmov 0.0|0.0   ;;  %vm480_vm0 = vmmov 0   ;;  %v481_v1 = vmov 0.0   ;;  %v90_v2 = vld [vmem:[#allocation9] sm:$0xff] }
  0x59   :  { %328 = vmatprep.subr.bf16.mxu0 %v479_v0  ;;  %334 = vmatprep.subr.bf16.mxu1 %v479_v0  ;;  %v91_v3 = vld [vmem:[#allocation9 + $0x8] sm:$0xff]  ;;  %v87_v4 = vld [vmem:[%s605_s4] sm:$0xff]  ;;  %v92_v7 = vld [vmem:[#allocation9 + $0x10] sm:$0xff]  ;;  %s482_s14 = smov 32   ;;  %vm168_vm1 = vcmask 130048   ;;  %vm94_vm2 = vcmask 261120  }
  0x5a   :  { %325 = vmatprep.mubr.msk.f32.mxu1 %vm480_vm0, %v481_v1  ;;  %318 = vmatprep.mubr.msk.f32.mxu0 %vm480_vm0, %v481_v1  ;;  %v329_v5 = vpack.c.bf16 %v91_v3, %v90_v2  ;;  %v88_v6 = vld [vmem:[%s605_s4 + $0x8] sm:$0xff]  ;;  %v93_v8 = vld [vmem:[#allocation9 + $0x18] sm:$0xff]  ;;  %v86_v12 = vld [vmem:[#allocation2] sm:$0xff]  ;;  %s483_s16 = smov 96   ;;  %vm287_vm3 = vcmask 523264   ;;  %vm289_vm4 = vcmask 785408  }
  0x5b   :  { %v335_v9 = vpack.c.bf16 %v88_v6, %v87_v4  ;;  %v257_v10 = vld [vmem:[#allocation7] sm:$0xff]  ;;  %v332_v11 = vpack.c.bf16 %v93_v8, %v92_v7  ;;  %v89_v13 = vld [vmem:[#allocation4] sm:$0xff]  ;;  %v301_v17 = vld [vmem:[%s607_s6] ss:$0 sm:$0xff]  ;;  %s484_s6 = smov 64  }
  0x5c   :  { %330 = vmatpush3.bf16.msra.mxu0 %v329_v5  ;;  %259 = vrot.lane.b32.xlu0 %v257_v10, %s482_s14  ;;  %v255_v27 = vld [vmem:[#allocation6] sm:$0xff] }
  0x5d   :  { %331 = vmatprep.subr.bf16.mxu0 %v479_v0  ;;  %336 = vmatpush3.bf16.msra.mxu1 %v335_v9 }
  0x60   :  { %333 = vmatpush3.bf16.msra.mxu0 %v332_v11  ;;  %326 = vmatmul.mubr.msk.f32.vlgmr.msra.gmra.mrb[0].mxu1 %vm168_vm1, %v86_v12 }
  0x63   :  { %319 = vmatmul.mubr.msk.f32.vlgmr.msra.gmra.mrb[0].mxu0 %vm94_vm2, %v89_v13 }
  0xce   :  { %v260_v24 = vpop.permute.xlu0 %259 }
 0x133   :  { %v238_v14 = vpop.f32.mrb[0].mxu1 }
 0x134   :  { %v327_v15 = vpop.f32.mrb[1].mxu1 }
 0x136   :  { %v164_v16 = vpop.f32.mrb[0].mxu0 }
 0x137   :  { %v239_v18 = vadd.f32 %v238_v14, %v164_v16  ;;  %v320_v19 = vpop.f32.mrb[1].mxu0 }
 0x139   :  { %v249_v20 = vadd.f32 %v301_v17, %v239_v18 }
 0x13b   :  { %v250_v21 = vmul.f32 0.5, %v249_v20 }
 0x13d   :  { %350 = vtanh.f32 %v250_v21 }
 0x147   :  { %v351_v22 = vpop.eup %350 }
 0x148   :  { %v252_v23 = vadd.f32 1.0, %v351_v22 }
 0x14a   :  { %v253_v25 = vmul.f32 0.5, %v252_v23 }
 0x14c   :  { %v262_v26 = vmul.f32 %v260_v24, %v253_v25  ;;  %v256_v28 = vmul.f32 %v255_v27, %v253_v25 }
 0x14e   :  { %264 = vrot.lane.b32.xlu0 %v262_v26, %s483_s16 }
 0x1c0   :  { %v265_v29 = vpop.permute.xlu0 %264 }
 0x1c1   :  { %v267_v30 = vadd.f32 %v265_v29, %v256_v28 }
 0x1c3   :  { %352 = vtanh.f32 %v267_v30  ;;  %279 = vrot.lane.b32.xlu0 %v267_v30, %s482_s14 }
 0x1c4   :  { %354 = vtanh.f32 %v249_v20 }
 0x1cd   :  { %v353_v31 = vpop.eup %352 }
 0x1ce   :  { %270 = vrot.lane.b32.xlu1 %v353_v31, %s484_s6  ;;  %v355_v34 = vpop.eup %354 }
 0x235   :  { %v280_v36 = vpop.permute.xlu0 %279 }
 0x240   :  { %v271_v32 = vpop.permute.xlu1 %270 }
 0x241   :  { %v273_v33 = vmul.f32 %v271_v32, %v253_v25 }
 0x243   :  { %275 = vrot.lane.b32.xlu1 %v273_v33, %s484_s6 }
 0x247   :  { %283 = vrot.lane.b32.xlu1 %v355_v34, %s483_s16 }
 0x2b5   :  { %v276_v35 = vpop.permute.xlu1 %275 }
 0x2b6   :  { %v286_v37 = vsel %vm94_vm2, %v276_v35, %v280_v36 }
 0x2b9   :  { %v284_v38 = vpop.permute.xlu1 %283 }
 0x2ba   :  { %v288_v39 = vsel %vm287_vm3, %v286_v37, %v284_v38 }
 0x2bb   :  { %v290_v40 = vsel %vm289_vm4, %v288_v39, 0.0 }
 0x2bc   :  { %291 = vst [vmem:[%s608_s7] sm:$0xff] %v290_v40 }
 0x2bd   :  { %296 = vsyncpa [#allocation3], 1 }
 0x2be   :  { %297 = vsyncpa [#allocation5], 1 }
 0x2bf   :  { %298 = vsyncpa [#allocation8], 1 }

</bundles_post_ra>
